<compile_context>
chip_gen: v7x
topology: tpu7x:2x2x1
jax: 0.10.0
libtpu: 0.0.40
codegen_flags: <defaults>
</compile_context>

<pallas_src>
import functools

import jax
import jax.numpy as jnp
from jax.experimental import pallas as pl
from jax.experimental.pallas import tpu as pltpu


def _round_up(n, m):
    return ((n + m - 1) // m) * m


def lstm_cell_kernel(xh_ref, cx_ref, w_ref, b_ref, hy_ref, cy_ref):
    # One fused MXU matmul: [TB, K] @ [K, 4*Hp] -> f32 [TB, 4*Hp]
    gates = jnp.dot(xh_ref[...], w_ref[...],
                    preferred_element_type=jnp.float32) + b_ref[...]

    Hp = hy_ref.shape[-1]                       # multiple of 128 -> lane aligned
    in_gate     = jax.nn.sigmoid(gates[:, 0 * Hp:1 * Hp])
    forget_gate = jax.nn.sigmoid(gates[:, 1 * Hp:2 * Hp])
    cell_gate   = jnp.tanh(      gates[:, 2 * Hp:3 * Hp])
    out_gate    = jax.nn.sigmoid(gates[:, 3 * Hp:4 * Hp])

    cx = cx_ref[...].astype(jnp.float32)
    cy = forget_gate * cx + in_gate * cell_gate
    hy = out_gate * jnp.tanh(cy)

    cy_ref[...] = cy.astype(cy_ref.dtype)
    hy_ref[...] = hy.astype(hy_ref.dtype)


def prepare_c_lstm_params(w_ih, w_hh, b_ih=None, b_hh=None, param_dtype=None):
    """One-time parameter preparation (hoisted out of the per-step hot path).

    Returns (w_cat, bias, hidden_size) where
      w_cat : [IN+H, 4*Hpad]  (K-concatenated, transposed, lane-padded weights)
      bias  : [1, 4*Hpad]     (b_ih + b_hh, lane-padded, f32)
    """
    four_h, input_size = w_ih.shape
    H = four_h // 4
    Hp = _round_up(H, 128)
    K = input_size + H
    param_dtype = param_dtype or w_ih.dtype

    # [K, 4H] = concat([w_ih.T, w_hh.T], K-axis); pad each gate block to Hp lanes.
    w_cat = jnp.concatenate([w_ih.T, w_hh.T], axis=0).reshape(K, 4, H)
    w_cat = jnp.pad(w_cat, ((0, 0), (0, 0), (0, Hp - H)))
    w_cat = w_cat.reshape(K, 4 * Hp).astype(param_dtype)

    if b_ih is not None:
        bias = b_ih + b_hh
    else:
        bias = jnp.zeros((4 * H,), jnp.float32)
    bias = bias.reshape(4, H)
    bias = jnp.pad(bias, ((0, 0), (0, Hp - H)))
    bias = bias.reshape(1, 4 * Hp).astype(jnp.float32)

    return w_cat, bias, H


@functools.partial(jax.jit, static_argnames=("hidden_size", "batch_tile"))
def c_lstm_cell_step(x, hx, cx, w_cat, bias, *, hidden_size, batch_tile=256):
    """One LSTM-cell step: returns (hy, cy), both [B, H]."""
    H = hidden_size
    K, four_hp = w_cat.shape
    Hp = four_hp // 4
    B = x.shape[0]

    # Batch tiling: multiple of the 8-row f32 sublane tile.
    TB = max(8, (min(batch_tile, _round_up(B, 8)) // 8) * 8)
    Bp = _round_up(B, TB)
    grid = (Bp // TB,)

    # Fuse the two matmuls by concatenating along K (cheap activation glue).
    xh = jnp.concatenate([x, hx], axis=1)                 # [B, K]
    xh_p = jnp.pad(xh, ((0, Bp - B), (0, 0)))             # [Bp, K]
    cx_p = jnp.pad(cx, ((0, Bp - B), (0, Hp - H)))        # [Bp, Hp]

    # VMEM budget: resident weights + double-buffered activation tiles + f32 gates.
    act_bytes = x.dtype.itemsize
    est = (w_cat.size * w_cat.dtype.itemsize + bias.size * 4
           + 2 * TB * (K + 3 * Hp) * act_bytes
           + TB * 4 * Hp * 4)
    vmem_limit = int(min(max(2 * est, 32 * 2 ** 20), 100 * 2 ** 20))

    hy_p, cy_p = pl.pallas_call(
        lstm_cell_kernel,
        out_shape=(
            jax.ShapeDtypeStruct((Bp, Hp), x.dtype),
            jax.ShapeDtypeStruct((Bp, Hp), x.dtype),
        ),
        grid_spec=pltpu.PrefetchScalarGridSpec(
            num_scalar_prefetch=0,
            grid=grid,
            in_specs=[
                pl.BlockSpec((TB, K), lambda b: (b, 0)),         # xh tile
                pl.BlockSpec((TB, Hp), lambda b: (b, 0)),        # cx tile
                pl.BlockSpec((K, 4 * Hp), lambda b: (0, 0)),     # weights: VMEM-resident
                pl.BlockSpec((1, 4 * Hp), lambda b: (0, 0)),     # bias:    VMEM-resident
            ],
            out_specs=(
                pl.BlockSpec((TB, Hp), lambda b: (b, 0)),        # hy tile
                pl.BlockSpec((TB, Hp), lambda b: (b, 0)),        # cy tile
            ),
        ),
        input_output_aliases={1: 1},                              # cx buffer -> cy
        compiler_params=pltpu.CompilerParams(
            dimension_semantics=("parallel",),                    # shard batch across TCs (v7x)
            vmem_limit_bytes=vmem_limit,
        ),
    )(xh_p, cx_p, w_cat, bias)

    # Slice padded rows/lanes back off before returning.
    return hy_p[:B, :H], cy_p[:B, :H]


def c_lstm_cell(x, hx, cx, w_ih, w_hh, b_ih, b_hh):
    """Compatibility wrapper matching C_LSTMCell.forward(input, (hx, cx)).

    For sequence use, call prepare_c_lstm_params once and reuse the result
    across steps instead of going through this wrapper every step.
    """
    w_cat, bias, H = prepare_c_lstm_params(w_ih, w_hh, b_ih, b_hh)
    return c_lstm_cell_step(x, hx, cx, w_cat, bias, hidden_size=H)


if __name__ == "__main__":
    # Small shapes consistent with the module: batch=2, input_size=16, hidden=32
    B, IN, H = 2, 16, 32
    key = jax.random.PRNGKey(0)
    k = jax.random.split(key, 7)

    # Deterministic parameter init mirroring uniform_(-0.1, 0.1)
    w_ih = jax.random.uniform(k[0], (4 * H, IN), jnp.float32, -0.1, 0.1)
    w_hh = jax.random.uniform(k[1], (4 * H, H), jnp.float32, -0.1, 0.1)
    b_ih = jax.random.uniform(k[2], (4 * H,), jnp.float32, -0.1, 0.1)
    b_hh = jax.random.uniform(k[3], (4 * H,), jnp.float32, -0.1, 0.1)

    x = jax.random.normal(k[4], (B, IN), jnp.float32)
    hx = jax.random.normal(k[5], (B, H), jnp.float32)
    cx = jax.random.normal(k[6], (B, H), jnp.float32)

    # Prepare params once (hoisted), then run one step.
    w_cat, bias, hidden = prepare_c_lstm_params(w_ih, w_hh, b_ih, b_hh)
    hy, cy = c_lstm_cell_step(x, hx, cx, w_cat, bias, hidden_size=hidden)
    jax.block_until_ready((hy, cy))

    # Pure-JAX reference check (same semantics as the PyTorch forward).
    gates = x @ w_ih.T + b_ih + hx @ w_hh.T + b_hh
    i, f, g, o = jnp.split(gates, 4, axis=1)
    i, f, o = jax.nn.sigmoid(i), jax.nn.sigmoid(f), jax.nn.sigmoid(o)
    g = jnp.tanh(g)
    cy_ref = f * cx + i * g
    hy_ref = o * jnp.tanh(cy_ref)
    assert hy.shape == (B, H) and cy.shape == (B, H)
    assert jnp.allclose(hy, hy_ref, atol=1e-5), "hy mismatch"
    assert jnp.allclose(cy, cy_ref, atol=1e-5), "cy mismatch"

    print("KERNEL_OK")
</pallas_src>

<mosaic_0001>
module attributes {stable_mosaic.version = 11 : i64} {
  func.func @lstm_cell_kernel(%arg0: i32, %arg1: memref<8x48xf32, #tpu.memory_space<vmem>>, %arg2: memref<8x128xf32, #tpu.memory_space<vmem>>, %arg3: memref<48x512xf32, #tpu.memory_space<vmem>>, %arg4: memref<1x512xf32, #tpu.memory_space<vmem>>, %arg5: memref<8x128xf32, #tpu.memory_space<vmem>>, %arg6: memref<8x128xf32, #tpu.memory_space<vmem>>) attributes {dimension_semantics = [#tpu.dimension_semantics<parallel>], iteration_bounds = array<i64: 1>, scalar_prefetch = 0 : i64, scratch_operands = 0 : i64, tpu.core_type = #tpu.core_type<tc>, window_params = [{transform_indices = @transform_0, window_bounds = array<i64: 8, 48>}, {transform_indices = @transform_1, window_bounds = array<i64: 8, 128>}, {pipeline_mode = #tpu.pipeline_mode<synchronous>, transform_indices = @transform_2, window_bounds = array<i64: 48, 512>}, {pipeline_mode = #tpu.pipeline_mode<synchronous>, transform_indices = @transform_3, window_bounds = array<i64: 1, 512>}, {transform_indices = @transform_4, window_bounds = array<i64: 8, 128>}, {transform_indices = @transform_5, window_bounds = array<i64: 8, 128>}]} {
    %c0 = arith.constant 0 : index
    %c0_0 = arith.constant 0 : index
    %0 = vector.load %arg1[%c0, %c0_0] : memref<8x48xf32, #tpu.memory_space<vmem>>, vector<8x48xf32>
    %c0_1 = arith.constant 0 : index
    %c0_2 = arith.constant 0 : index
    %1 = vector.load %arg3[%c0_1, %c0_2] : memref<48x512xf32, #tpu.memory_space<vmem>>, vector<48x512xf32>
    %cst = arith.constant dense<0.000000e+00> : vector<8x512xf32>
    %2 = tpu.matmul %0, %1, %cst {dimension_numbers = #tpu.dot_dimension_numbers<[1], [0], [0], [1], [0, 0, 1, 1], [], []>} : vector<8x48xf32>, vector<48x512xf32>, vector<8x512xf32> -> vector<8x512xf32>
    %c0_3 = arith.constant 0 : index
    %c0_4 = arith.constant 0 : index
    %3 = vector.load %arg4[%c0_3, %c0_4] : memref<1x512xf32, #tpu.memory_space<vmem>>, vector<1x512xf32>
    %4 = vector.broadcast %3 : vector<1x512xf32> to vector<8x512xf32>
    %5 = arith.addf %2, %4 : vector<8x512xf32>
    %6 = vector.extract_strided_slice %5 {offsets = [0, 0], sizes = [8, 128], strides = [1, 1]} : vector<8x512xf32> to vector<8x128xf32>
    %7 = arith.negf %6 : vector<8x128xf32>
    %8 = math.exp %7 : vector<8x128xf32>
    %cst_5 = arith.constant 1.000000e+00 : f32
    %9 = vector.broadcast %cst_5 : f32 to vector<8x128xf32>
    %10 = arith.addf %9, %8 : vector<8x128xf32>
    %11 = arith.divf %9, %10 : vector<8x128xf32>
    %12 = vector.extract_strided_slice %5 {offsets = [0, 128], sizes = [8, 128], strides = [1, 1]} : vector<8x512xf32> to vector<8x128xf32>
    %13 = arith.negf %12 : vector<8x128xf32>
    %14 = math.exp %13 : vector<8x128xf32>
    %cst_6 = arith.constant 1.000000e+00 : f32
    %15 = vector.broadcast %cst_6 : f32 to vector<8x128xf32>
    %16 = arith.addf %15, %14 : vector<8x128xf32>
    %17 = arith.divf %15, %16 : vector<8x128xf32>
    %18 = vector.extract_strided_slice %5 {offsets = [0, 256], sizes = [8, 128], strides = [1, 1]} : vector<8x512xf32> to vector<8x128xf32>
    %19 = math.tanh %18 : vector<8x128xf32>
    %20 = vector.extract_strided_slice %5 {offsets = [0, 384], sizes = [8, 128], strides = [1, 1]} : vector<8x512xf32> to vector<8x128xf32>
    %21 = arith.negf %20 : vector<8x128xf32>
    %22 = math.exp %21 : vector<8x128xf32>
    %cst_7 = arith.constant 1.000000e+00 : f32
    %23 = vector.broadcast %cst_7 : f32 to vector<8x128xf32>
    %24 = arith.addf %23, %22 : vector<8x128xf32>
    %25 = arith.divf %23, %24 : vector<8x128xf32>
    %c0_8 = arith.constant 0 : index
    %c0_9 = arith.constant 0 : index
    %26 = vector.load %arg2[%c0_8, %c0_9] : memref<8x128xf32, #tpu.memory_space<vmem>>, vector<8x128xf32>
    %27 = arith.mulf %17, %26 : vector<8x128xf32>
    %28 = arith.mulf %11, %19 : vector<8x128xf32>
    %29 = arith.addf %27, %28 : vector<8x128xf32>
    %30 = math.tanh %29 : vector<8x128xf32>
    %31 = arith.mulf %25, %30 : vector<8x128xf32>
    %c0_10 = arith.constant 0 : index
    %c0_11 = arith.constant 0 : index
    %32 = vector.load %arg6[%c0_10, %c0_11] : memref<8x128xf32, #tpu.memory_space<vmem>>, vector<8x128xf32>
    tpu.vector_store %arg6[%c0_10, %c0_11], %29 {strides = array<i32>} : memref<8x128xf32, #tpu.memory_space<vmem>>, vector<8x128xf32>,
    %c0_12 = arith.constant 0 : index
    %c0_13 = arith.constant 0 : index
    %33 = vector.load %arg5[%c0_12, %c0_13] : memref<8x128xf32, #tpu.memory_space<vmem>>, vector<8x128xf32>
    tpu.vector_store %arg5[%c0_12, %c0_13], %31 {strides = array<i32>} : memref<8x128xf32, #tpu.memory_space<vmem>>, vector<8x128xf32>,
    return
  }
  func.func @transform_0(%arg0: i32) -> (i32, i32) {
    %c0_i32 = arith.constant 0 : i32
    %c0_i32_0 = arith.constant 0 : i32
    return %arg0, %c0_i32 : i32, i32
  }
  func.func @transform_1(%arg0: i32) -> (i32, i32) {
    %c0_i32 = arith.constant 0 : i32
    %c0_i32_0 = arith.constant 0 : i32
    return %arg0, %c0_i32 : i32, i32
  }
  func.func @transform_2(%arg0: i32) -> (i32, i32) {
    %c0_i32 = arith.constant 0 : i32
    %c0_i32_0 = arith.constant 0 : i32
    %c0_i32_1 = arith.constant 0 : i32
    return %c0_i32, %c0_i32_0 : i32, i32
  }
  func.func @transform_3(%arg0: i32) -> (i32, i32) {
    %c0_i32 = arith.constant 0 : i32
    %c0_i32_0 = arith.constant 0 : i32
    %c0_i32_1 = arith.constant 0 : i32
    return %c0_i32, %c0_i32_0 : i32, i32
  }
  func.func @transform_4(%arg0: i32) -> (i32, i32) {
    %c0_i32 = arith.constant 0 : i32
    %c0_i32_0 = arith.constant 0 : i32
    return %arg0, %c0_i32 : i32, i32
  }
  func.func @transform_5(%arg0: i32) -> (i32, i32) {
    %c0_i32 = arith.constant 0 : i32
    %c0_i32_0 = arith.constant 0 : i32
    return %arg0, %c0_i32 : i32, i32
  }
}

</mosaic_0001>

<bundles_post_ra>
// kernel: c_lstm_cell_step.1
= control target key start
LH: loop header
LB: loop body
LE: loop exit
PB: predicated region body
PF: predicated region fallthrough
CT: control target
= control target key end

     0   :  { %11 = vsyncpa [#allocation3], 0  ;;  %s335_s18 = smov [#allocation2]   ;;  %s396_s0 = inlined_call_operand.vmem [shape: f32[8,48], index: 0, kind: input, shape index: {}]   ;;  %s397_s1 = inlined_call_operand.vmem [shape: f32[8,128], index: 1, kind: input, shape index: {}, may-alias: {1,5}]   ;;  %s398_s2 = inlined_call_operand.hbm [shape: f32[48,512], index: 2, kind: input, shape index: {}]   ;;  %s399_s3 = inlined_call_operand.vmem [shape: f32[1,512], index: 3, kind: input, shape index: {}]   ;;  %s400_s4 = inlined_call_operand.vmem [shape: f32[8,128], index: 4, kind: output, shape index: {0}]   ;;  %s401_s5 = inlined_call_operand.vmem [shape: f32[8,128], index: 5, kind: output, shape index: {1}, may-alias: {1,5}]  }
   0x1   :  { %s21_s19 = sshll.u32 %s335_s18, 4  ;;  %s311_s22 = scalar_lea.hbm %s398_s2, 3072  ;;  %s22_s19 = int_to_ptr.vmem [resolvable:$true] %s21_s19 }
   0x2   :  { %p312_p0 = scmp.ne.s32.totalorder %s398_s2, %s311_s22  ;;  %p315_p1 = scmp.lt.u32.totalorder %s311_s22, %s398_s2 }
   0x4   :  { %p317_p2 = pnand %p315_p1, %p312_p0 }
   0x6   :  { %320 = shalt.err (!%p317_p2)
}
   0x7   :  { %s321_s27 = scalar_lea.vmem %s22_s19, 3072  ;;  %p326_p4 = scmp.lt.s32.totalorder %s22_s19, %s22_s19 }
   0x8   :  { %p322_p3 = scmp.ne.s32.totalorder %s22_s19, %s321_s27  ;;  %p327_p5 = scmp.lt.s32.totalorder %s321_s27, %s321_s27 }
   0xa   :  { %p328_p6 = por %p327_p5, %p326_p4 }
   0xc   :  { %p329_p7 = pnand %p328_p6, %p322_p3 }
   0xe   :  { %332 = shalt.err (!%p329_p7)
}
   0xf   :  { %s336_s28 = smov 512   ;;  %s337_s29 = smov 32  }
  0x10   :  { %27 = dma.hbm_to_vmem [thread:$0]  %s398_s2, 3072, %s22_s19, [#allocation3], %s336_s28, %s336_s28, %s337_s29  }
  0x11   :  { %333 = dma.done.wait [#allocation3], 3072  }
  0x12   :  { %334 = vsyncadd [#allocation3], 4294964224  ;;  %v338_v0 = vmov 0.0   ;;  %v35_v1 = vld [vmem:[#allocation2 + $0x8] sm:$0xff]  ;;  %v34_v3 = vld [vmem:[#allocation2] sm:$0xff]  ;;  %vm80_vm0 = vcmask 392192   ;;  %v60_v38 = vlaneseq }
  0x13   :  { %148 = vmatprep.mubr.f32.mxu0 %v338_v0  ;;  %219 = vmatprep.mubr.f32.mxu1 %v338_v0  ;;  %v39_v2 = vld [vmem:[#allocation2 + $0x28] sm:$0xff]  ;;  %v38_v5 = vld [vmem:[#allocation2 + $0x20] sm:$0xff]  ;;  %v37_v17 = vld [vmem:[#allocation2 + $0x18] sm:$0xff] }
  0x14   :  { %v267_v4 = vpack.c.bf16 %v39_v2, %v35_v1  ;;  %v43_v6 = vld [vmem:[#allocation2 + $0x48] sm:$0xff]  ;;  %v269_v8 = vpack.c.bf16 %v38_v5, %v34_v3  ;;  %v42_v10 = vld [vmem:[#allocation2 + $0x40] sm:$0xff]  ;;  %v41_v18 = vld [vmem:[#allocation2 + $0x38] sm:$0xff]  ;;  %v61_v39 = vshrl.u32 %v60_v38, 7 }
  0x15   :  { %v47_v7 = vld [vmem:[#allocation2 + $0x68] sm:$0xff]  ;;  %v46_v11 = vld [vmem:[#allocation2 + $0x60] sm:$0xff]  ;;  %v279_v20 = vpack.c.bf16 %v41_v18, %v37_v17  ;;  %v36_v21 = vld [vmem:[#allocation2 + $0x10] sm:$0xff] }
  0x16   :  { %v271_v9 = vpack.c.bf16 %v47_v7, %v43_v6  ;;  %v51_v12 = vld [vmem:[#allocation2 + $0x88] sm:$0xff]  ;;  %268 = vmatprep.subr.bf16.mxu0 %v267_v4  ;;  %v50_v14 = vld [vmem:[#allocation2 + $0x80] sm:$0xff]  ;;  %v273_v15 = vpack.c.bf16 %v46_v11, %v42_v10  ;;  %v40_v22 = vld [vmem:[#allocation2 + $0x30] sm:$0xff]  ;;  %v62_v40 = vsub.s32 0, %v61_v39  ;;  %v66_v42 = vsub.s32 1, %v61_v39 }
  0x17   :  { %v55_v13 = vld [vmem:[#allocation2 + $0xa8] sm:$0xff]  ;;  %270 = vmatpush1.bf16.msra.mxu0 %v269_v8  ;;  %v54_v16 = vld [vmem:[#allocation2 + $0xa0] sm:$0xff]  ;;  %v45_v23 = vld [vmem:[#allocation2 + $0x58] sm:$0xff]  ;;  %v281_v24 = vpack.c.bf16 %v40_v22, %v36_v21  ;;  %280 = vmatprep.subr.bf16.mxu1 %v279_v20  ;;  %v74_v45 = vsub.s32 3, %v61_v39  ;;  %v70_v53 = vsub.s32 2, %v61_v39 }
  0x18   :  { %272 = vmatprep.subr.bf16.mxu0 %v271_v9  ;;  %v275_v19 = vpack.c.bf16 %v55_v13, %v51_v12  ;;  %v49_v25 = vld [vmem:[#allocation2 + $0x78] sm:$0xff]  ;;  %v44_v26 = vld [vmem:[#allocation2 + $0x50] sm:$0xff]  ;;  %v277_v31 = vpack.c.bf16 %v54_v16, %v50_v14  ;;  %v33_v36 = vld [vmem:[%s396_s0] sm:$0xff] }
  0x19   :  { %v48_v27 = vld [vmem:[#allocation2 + $0x70] sm:$0xff]  ;;  %v283_v28 = vpack.c.bf16 %v49_v25, %v45_v23  ;;  %v53_v29 = vld [vmem:[#allocation2 + $0x98] sm:$0xff]  ;;  %282 = vmatpush1.bf16.msra.mxu1 %v281_v24  ;;  %v58_v41 = vld [vmem:[%s399_s3] sm:$0xf] }
  0x1a   :  { %v57_v30 = vld [vmem:[#allocation2 + $0xb8] sm:$0xff]  ;;  %v285_v32 = vpack.c.bf16 %v48_v27, %v44_v26  ;;  %v52_v34 = vld [vmem:[#allocation2 + $0x90] sm:$0xff]  ;;  %v63_v43 = vrot.slane %v58_v41, %v62_v40  ;;  %v67_v44 = vrot.slane %v58_v41, %v66_v42  ;;  %v75_v51 = vrot.slane %v58_v41, %v74_v45  ;;  %v245_v2 = vld [vmem:[%s397_s1] sm:$0xff] }
  0x1b   :  { %274 = vmatpush1.bf16.msra.mxu0 %v273_v15  ;;  %284 = vmatprep.subr.bf16.mxu1 %v283_v28  ;;  %v287_v33 = vpack.c.bf16 %v57_v30, %v53_v29  ;;  %v56_v35 = vld [vmem:[#allocation2 + $0xb0] sm:$0xff]  ;;  %v71_v57 = vrot.slane %v58_v41, %v70_v53 }
  0x1c   :  { %276 = vmatprep.subr.bf16.mxu0 %v275_v19  ;;  %v289_v37 = vpack.c.bf16 %v56_v35, %v52_v34 }
  0x1d   :  { %286 = vmatpush1.bf16.msra.mxu1 %v285_v32 }
  0x1e   :  { %288 = vmatprep.subr.bf16.mxu1 %v287_v33 }
  0x1f   :  { %278 = vmatpush1.bf16.msra.mxu0 %v277_v31 }
  0x21   :  { %290 = vmatpush1.bf16.msra.mxu1 %v289_v37 }
  0x22   :  { %262 = vmatmul.mubr.msk.f32.vlgmr.msra.gmra.mrb[0].mxu0 %vm80_vm0, %v33_v36 }
  0x24   :  { %263 = vmatmul.mubr.msk.f32.vlgmr.msra.gmra.mrb[0].mxu1 %vm80_vm0, %v33_v36 }
  0xf5   :  { %v150_v46 = vpop.f32.mrb[0].mxu0 }
  0xf6   :  { %v151_v47 = vadd.f32 %v150_v46, %v63_v43  ;;  %v152_v48 = vpop.f32.mrb[1].mxu0 }
  0xf7   :  { %v153_v49 = vadd.f32 %v152_v48, %v67_v44  ;;  %v221_v54 = vpop.f32.mrb[0].mxu1 }
  0xf8   :  { %v264_v50 = vmul.f32 -1.442695, %v151_v47  ;;  %v223_v55 = vpop.f32.mrb[1].mxu1  ;;  %v222_v59 = vadd.f32 %v221_v54, %v71_v57 }
  0xf9   :  { %v265_v52 = vmul.f32 -1.442695, %v153_v49  ;;  %v224_v56 = vadd.f32 %v223_v55, %v75_v51 }
  0xfa   :  { %295 = vpow2.f32 %v264_v50 }
  0xfb   :  { %297 = vpow2.f32 %v265_v52  ;;  %v266_v58 = vmul.f32 -1.442695, %v224_v56 }
  0xfd   :  { %299 = vpow2.f32 %v266_v58 }
  0xfe   :  { %301 = vtanh.f32 %v222_v59 }
 0x104   :  { %v296_v60 = vpop.eup %295 }
 0x105   :  { %v298_v61 = vpop.eup %297  ;;  %v229_v62 = vadd.f32 1.0, %v296_v60 }
 0x106   :  { %v235_v63 = vadd.f32 1.0, %v298_v61 }
 0x107   :  { %303 = vrcp.f32 %v229_v62  ;;  %v300_v0 = vpop.eup %299 }
 0x108   :  { %305 = vrcp.f32 %v235_v63  ;;  %v302_v1 = vpop.eup %301  ;;  %v242_v4 = vadd.f32 1.0, %v300_v0 }
 0x10a   :  { %307 = vrcp.f32 %v242_v4 }
 0x111   :  { %v304_v3 = vpop.eup %303 }
 0x112   :  { %v306_v5 = vpop.eup %305  ;;  %v247_v6 = vmul.f32 %v304_v3, %v302_v1 }
 0x113   :  { %v246_v7 = vmul.f32 %v306_v5, %v245_v2 }
 0x114   :  { %v308_v9 = vpop.eup %307 }
 0x115   :  { %v248_v8 = vadd.f32 %v247_v6, %v246_v7 }
 0x117   :  { %309 = vtanh.f32 %v248_v8  ;;  %251 = vst [vmem:[%s401_s5] sm:$0xff] %v248_v8 }
 0x121   :  { %v310_v10 = vpop.eup %309 }
 0x122   :  { %v250_v11 = vmul.f32 %v310_v10, %v308_v9 }
 0x124   :  { %252 = vst [vmem:[%s400_s4] sm:$0xff] %v250_v11 }
 0x125   :  { %261 = vsyncpa [#allocation3], 1 }

</bundles_post_ra>
